<compile_context>
chip_gen: v7x
topology: tpu7x:2x2x1
jax: 0.10.0
libtpu: 0.0.40
codegen_flags: <defaults>
</compile_context>

<pallas_src>
import jax
import jax.numpy as jnp
from jax.experimental import pallas as pl
from jax.experimental.pallas import tpu as pltpu


def _round_up(x, m):
    return (x + m - 1) // m * m


def conv1x1_bnr_kernel(x_ref, w_ref, b_ref, o_ref):
    # x_ref: (TM, Cin)      bf16 activations (rows = flattened N*H*W pixels)
    # w_ref: (Cin, TCout)   bf16 weights with BN scale pre-folded
    # b_ref: (1, TCout)     f32 fused bias  = (conv_bias - mean) * scale + beta
    # o_ref: (TM, TCout)    f32 output tile (lane-dense: TCout % 128 == 0)
    acc = jnp.dot(x_ref[...], w_ref[...], preferred_element_type=jnp.float32)
    o_ref[...] = jnp.maximum(acc + b_ref[...], 0.0).astype(o_ref.dtype)


def conv1x1_bn_relu(x_nchw, w_oihw, conv_bias, gamma, beta,
                    running_mean, running_var, eps=1e-5, tm=256, tcout=128):
    """Conv1x1 forward. x_nchw: (N, Cin, H, W); w_oihw: (Cout, Cin, 1, 1)."""
    N, Cin, H, W = x_nchw.shape
    Cout = w_oihw.shape[0]
    M = N * H * W

    # ---- Fold eval-mode BN + conv bias (plain JAX glue, runs once per call) ----
    scale = gamma / jnp.sqrt(running_var + eps)                    # (Cout,)
    w_ic = jnp.transpose(w_oihw[:, :, 0, 0], (1, 0))               # (Cin, Cout)
    w_fused = (w_ic * scale[None, :]).astype(jnp.bfloat16)         # scale folded in
    bias_fused = ((conv_bias - running_mean) * scale + beta).astype(jnp.float32)

    # ---- Layout: NCHW -> channels-last, flatten pixels to rows of a matmul ----
    x_2d = jnp.transpose(x_nchw, (0, 2, 3, 1)).reshape(M, Cin).astype(jnp.bfloat16)

    # ---- Pad M (sublane/grid) and Cout (lane-dense, multiple of 128) ----
    tm = min(tm, _round_up(M, 8))
    M_pad = _round_up(M, tm)
    Cout_pad = _round_up(Cout, tcout)
    if M_pad != M:
        x_2d = jnp.pad(x_2d, ((0, M_pad - M), (0, 0)))
    if Cout_pad != Cout:
        w_fused = jnp.pad(w_fused, ((0, 0), (0, Cout_pad - Cout)))
        bias_fused = jnp.pad(bias_fused, (0, Cout_pad - Cout))
    bias_fused = bias_fused.reshape(1, Cout_pad)

    grid = (M_pad // tm, Cout_pad // tcout)

    out = pl.pallas_call(
        conv1x1_bnr_kernel,
        out_shape=jax.ShapeDtypeStruct((M_pad, Cout_pad), jnp.float32),
        grid=grid,
        in_specs=[
            pl.BlockSpec((tm, Cin), lambda i, j: (i, 0)),       # activations tile
            pl.BlockSpec((Cin, tcout), lambda i, j: (0, j)),    # fused weights tile
            pl.BlockSpec((1, tcout), lambda i, j: (0, j)),      # fused bias tile
        ],
        out_specs=pl.BlockSpec((tm, tcout), lambda i, j: (i, j)),
        compiler_params=pltpu.CompilerParams(
            dimension_semantics=("parallel", "parallel")),
    )(x_2d, w_fused, bias_fused)

    out = out[:M, :Cout].reshape(N, H, W, Cout)
    return jnp.transpose(out, (0, 3, 1, 2))  # back to NCHW


def _reference(x_nchw, w_oihw, conv_bias, gamma, beta, mean, var, eps=1e-5):
    """Pure-JAX reference following the same bf16-input / f32-accumulate path."""
    scale = gamma / jnp.sqrt(var + eps)
    w_f = (jnp.transpose(w_oihw[:, :, 0, 0], (1, 0)) * scale[None, :])
    w_f = w_f.astype(jnp.bfloat16).astype(jnp.float32)             # (Cin, Cout)
    bias_f = (conv_bias - mean) * scale + beta
    x = jnp.transpose(x_nchw, (0, 2, 3, 1)).astype(jnp.bfloat16).astype(jnp.float32)
    y = jnp.einsum("nhwc,co->nhwo", x, w_f) + bias_f[None, None, None, :]
    y = jnp.maximum(y, 0.0)
    return jnp.transpose(y, (0, 3, 1, 2))


if __name__ == "__main__":
    key = jax.random.PRNGKey(0)
    k_x, k_w, k_cb, k_g, k_b, k_m, k_v = jax.random.split(key, 7)

    N, Cin, Cout, H, W = 2, 4, 8, 16, 16  # small synthetic shapes

    x = jax.random.normal(k_x, (N, Cin, H, W), dtype=jnp.float32)
    # Deterministic parameter init (synthetic, mimics module shapes).
    w = jax.random.normal(k_w, (Cout, Cin, 1, 1), dtype=jnp.float32) * 0.1
    conv_bias = jax.random.normal(k_cb, (Cout,), dtype=jnp.float32) * 0.1
    gamma = jax.random.normal(k_g, (Cout,), dtype=jnp.float32) * 0.1 + 1.0
    beta = jax.random.normal(k_b, (Cout,), dtype=jnp.float32) * 0.1
    running_mean = jax.random.normal(k_m, (Cout,), dtype=jnp.float32) * 0.1
    running_var = jnp.abs(jax.random.normal(k_v, (Cout,), dtype=jnp.float32)) * 0.1 + 1.0

    out = conv1x1_bn_relu(x, w, conv_bias, gamma, beta, running_mean, running_var)
    out = jax.block_until_ready(out)

    ref = _reference(x, w, conv_bias, gamma, beta, running_mean, running_var)
    assert out.shape == (N, Cout, H, W)
    assert jnp.allclose(out, ref, atol=1e-4, rtol=1e-4), "mismatch vs reference"

    print("KERNEL_OK")
</pallas_src>

<mosaic_0001>
module attributes {stable_mosaic.version = 11 : i64} {
  func.func @conv1x1_bnr_kernel(%arg0: i32, %arg1: i32, %arg2: memref<256x4xbf16, #tpu.memory_space<vmem>>, %arg3: memref<4x128xbf16, #tpu.memory_space<vmem>>, %arg4: memref<1x128xf32, #tpu.memory_space<vmem>>, %arg5: memref<256x128xf32, #tpu.memory_space<vmem>>) attributes {dimension_semantics = [#tpu.dimension_semantics<parallel>, #tpu.dimension_semantics<parallel>], iteration_bounds = array<i64: 2, 1>, scalar_prefetch = 0 : i64, scratch_operands = 0 : i64, tpu.core_type = #tpu.core_type<tc>, window_params = [{transform_indices = @transform_0, window_bounds = array<i64: 256, 4>}, {transform_indices = @transform_1, window_bounds = array<i64: 4, 128>}, {transform_indices = @transform_2, window_bounds = array<i64: 1, 128>}, {transform_indices = @transform_3, window_bounds = array<i64: 256, 128>}]} {
    %c0 = arith.constant 0 : index
    %c0_0 = arith.constant 0 : index
    %0 = vector.load %arg2[%c0, %c0_0] : memref<256x4xbf16, #tpu.memory_space<vmem>>, vector<256x4xbf16>
    %c0_1 = arith.constant 0 : index
    %c0_2 = arith.constant 0 : index
    %1 = vector.load %arg3[%c0_1, %c0_2] : memref<4x128xbf16, #tpu.memory_space<vmem>>, vector<4x128xbf16>
    %cst = arith.constant dense<0.000000e+00> : vector<256x128xf32>
    %2 = tpu.matmul %0, %1, %cst {dimension_numbers = #tpu.dot_dimension_numbers<[1], [0], [0], [1], [0, 0, 1, 1], [], []>} : vector<256x4xbf16>, vector<4x128xbf16>, vector<256x128xf32> -> vector<256x128xf32>
    %c0_3 = arith.constant 0 : index
    %c0_4 = arith.constant 0 : index
    %3 = vector.load %arg4[%c0_3, %c0_4] : memref<1x128xf32, #tpu.memory_space<vmem>>, vector<1x128xf32>
    %4 = vector.broadcast %3 : vector<1x128xf32> to vector<256x128xf32>
    %5 = arith.addf %2, %4 : vector<256x128xf32>
    %cst_5 = arith.constant 0.000000e+00 : f32
    %6 = vector.broadcast %cst_5 : f32 to vector<256x128xf32>
    %7 = arith.maximumf %5, %6 : vector<256x128xf32>
    %c0_6 = arith.constant 0 : index
    %c0_7 = arith.constant 0 : index
    %8 = vector.load %arg5[%c0_6, %c0_7] : memref<256x128xf32, #tpu.memory_space<vmem>>, vector<256x128xf32>
    tpu.vector_store %arg5[%c0_6, %c0_7], %7 {strides = array<i32>} : memref<256x128xf32, #tpu.memory_space<vmem>>, vector<256x128xf32>,
    return
  }
  func.func @transform_0(%arg0: i32, %arg1: i32) -> (i32, i32) {
    %c0_i32 = arith.constant 0 : i32
    %c0_i32_0 = arith.constant 0 : i32
    return %arg0, %c0_i32 : i32, i32
  }
  func.func @transform_1(%arg0: i32, %arg1: i32) -> (i32, i32) {
    %c0_i32 = arith.constant 0 : i32
    %c0_i32_0 = arith.constant 0 : i32
    return %c0_i32, %arg1 : i32, i32
  }
  func.func @transform_2(%arg0: i32, %arg1: i32) -> (i32, i32) {
    %c0_i32 = arith.constant 0 : i32
    %c0_i32_0 = arith.constant 0 : i32
    return %c0_i32, %arg1 : i32, i32
  }
  func.func @transform_3(%arg0: i32, %arg1: i32) -> (i32, i32) {
    %c0_i32 = arith.constant 0 : i32
    return %arg0, %arg1 : i32, i32
  }
}

</mosaic_0001>

<bundles_post_ra>
// kernel: tpu_custom_call.1
= control target key start
LH: loop header
LB: loop body
LE: loop exit
PB: predicated region body
PF: predicated region fallthrough
CT: control target
= control target key end

     0   :  { %8 = vsyncpa [#allocation3], 0  ;;  %s1237_s0 = inlined_call_operand.vmem [shape: bf16[512,4], index: 0, kind: input, shape index: {}]   ;;  %s1238_s1 = inlined_call_operand.vmem [shape: bf16[4,128], index: 1, kind: input, shape index: {}]   ;;  %s1239_s2 = inlined_call_operand.vmem [shape: f32[1,128], index: 2, kind: input, shape index: {}]   ;;  %s1240_s3 = inlined_call_operand.hbm [shape: f32[512,128], index: 3, kind: output, shape index: {}]  }
   0x1   :  { %10 = vsyncpa [#allocation3 + $0x1], 0  ;;  %s1010_s12 = smov 0   ;;  %s1012_s13 = smov 0  }
   0x2   :  { %s1014_s14 = smov 0   ;;  %s1016_s15 = smov 0  }
   0x3   :  { %s1018_s16 = smov 0   ;;  %s1020_s17 = smov 0  }
   0x4 LB: > { %s730_s18 = sadd.s32 4294967295, %s985_s17   ;;  %s731_s19 = sadd.s32 4294967294, %s985_s17   ;;  %s985_s17 = sphi %s1020_s17, %s16_s17   ;;  %s981_s16 = sphi %s1018_s16, %s1247_s16   ;;  %s977_s15 = sphi %s1016_s15, %s1246_s15   ;;  %s973_s14 = sphi %s1014_s14, %s1245_s14   ;;  %s969_s13 = sphi %s1012_s13, %s1244_s13   ;;  %s965_s12 = sphi %s1010_s12, %s1243_s12  }
   0x5   : > { %s28_s20 = sadd.s32 1, %s981_s16  ;;  %s115_s21 = sadd.s32 1, %s973_s14 }
   0x6   : > { %p30_p0 = scmp.ge.s32.totalorder %s28_s20, 2  ;;  %p125_p1 = scmp.ne.s32.totalorder %s973_s14, %s969_s13 }
   0x7   : > { %p126_p2 = scmp.eq.s32.totalorder %s730_s18, 1  ;;  %p131_p3 = scmp.ne.s32.totalorder %s969_s13, %s965_s12 }
   0x8   : > { %s1249_s20 = smov (%p30_p0, %s28_s20), 0  ;;  %p132_p5 = scmp.eq.s32.totalorder %s731_s19, 1 }
   0x9   : > { %p1050_p4 = por %p126_p2, %p125_p1  ;;  %s110_s23 = ssub.s32 %s981_s16, %s1249_s20 }
   0xa   : > { %p736_p6 = scmp.ge.s32.totalorder %s985_s17, 1  ;;  %p113_p7 = scmp.eq.s32.totalorder %s110_s23, 0 }
   0xb   : > { %p1057_p8 = por %p132_p5, %p131_p3  ;;  %p172_p9 = scmp.lt.s32.totalorder %s985_s17, 3 }
   0xc   : > { %s1063_s25 = scalar_select %p113_p7, %s973_s14, %s115_s21  }
   0xd   : > { %p173_p10 = pnand %p736_p6, %p172_p9 }
   0xe   : > { %v250_v0 = vld [vmem:[%s1238_s1] sm:$0x3] (!%p173_p10)  ;;  %vm387_vm0 = vcmask (!%p173_p10), 1041408   ;;  %s738_s28 = sshll.u32 (!%p173_p10), %s977_s15, 5  ;;  %vm338_vm1 = vcmask (!%p173_p10), 31744   ;;  %s200_s6 = sand.u32 (!%p173_p10), 1, %s969_s13  }
   0xf   : > { %176 = sbr.rel (%p173_p10) target bundleno = 286 (0x11e), region = 32  ;;  %832 = vmatprep.subr.msk.bf16.mxu0 (!%p173_p10), %vm387_vm0, %v250_v0  ;;  %833 = vmatprep.subr.msk.bf16.mxu1 (!%p173_p10), %vm387_vm0, %v250_v0  ;;  %v389_v1 = vsel (!%p173_p10), %vm387_vm0, %v250_v0, 0  ;;  %p204_p11 = scmp.lt.s32.totalorder (!%p173_p10), %s738_s28, 63  ;;  %v1110_v18 = vld [vmem:[%s1239_s2] ss:$0 sm:$0xff] (!%p173_p10) }
  0x10   : > { %797 = vmatpush3.bf16.msra.mxu0 (!%p173_p10), %v389_v1  ;;  %831 = vmatpush3.bf16.msra.mxu1 (!%p173_p10), %v389_v1  ;;  %s737_s9 = sshll.u32 (!%p173_p10), %s200_s6, 8  ;;  %s778_s11 = sshll.u32 (!%p173_p10), %s977_s15, 12 }
  0x11   : > { %s1121_s10 = scalar_lea.vmem (!%p173_p10), [#allocation2], %s737_s9  ;;  %s1180_s21 = scalar_lea.hbm (!%p173_p10), %s1240_s3, %s778_s11 }
  0x12   : > { %s631_s18 = sshll.u32 (!%p173_p10), %s1121_s10, 4  ;;  %s1191_s23 = scalar_lea.sflag (!%p173_p10), [#allocation3], %s200_s6  ;;  %s1182_s18 = int_to_ptr.vmem [resolvable:$true] %s631_s18 }
  0x13   : > { %s907_s26 = scalar_lea.vmem (!%p173_p10), %s1182_s18, 4096  ;;  %s987_s27 = smov (!%p173_p10), [#allocation2]  }
  0x14   : > { %p908_p12 = scmp.ne.s32.totalorder (!%p173_p10), %s1182_s18, %s907_s26 }
  0x16   : > { %s1251_s28 = smov (!%p204_p11, %s738_s28), 63  ;;  %p909_p13 = pnand %p908_p12, %p1050_p4 }
  0x17   : > { %s739_s29 = sshll.u32 %s1251_s28, 2  ;;  %s911_s28 = sshll.u32 %s987_s27, 4  ;;  %s912_s28 = int_to_ptr.vmem [resolvable:$false] %s911_s28 }
  0x18   : > { %s1072_s5 = scalar_lea.vmem %s1237_s0, %s739_s29  ;;  %p910_p0 = pneg %p909_p13 }
  0x19   : > { %v891_v2 = vld [vmem:[%s1072_s5] sm:$0xff]   ;;  %v893_v4 = vld [vmem:[%s1072_s5 + $0x8] sm:$0xff]   ;;  %v895_v6 = vld [vmem:[%s1072_s5 + $0x10] sm:$0xff]   ;;  %s913_s29 = scalar_lea.vmem %s912_s28, 8192  ;;  %p914_p1 = scmp.lt.s32.totalorder %s1182_s18, %s912_s28 }
  0x1a   : > { %v892_v3 = vld [vmem:[%s1072_s5 + $0x40] sm:$0xff]   ;;  %798 = vmatprep.mubr.msk.bf16.mxu0 %vm338_vm1, %v891_v2  ;;  %v894_v5 = vld [vmem:[%s1072_s5 + $0x48] sm:$0xff]   ;;  %v896_v7 = vld [vmem:[%s1072_s5 + $0x50] sm:$0xff]   ;;  %p915_p2 = scmp.lt.s32.totalorder %s913_s29, %s907_s26 }
  0x1b   : > { %814 = vmatprep.mubr.msk.bf16.mxu1 %vm338_vm1, %v892_v3  ;;  %799 = vmatmul.mubr.msk.bf16.vlgmr.msra.gmra.mrb[0].mxu0 %vm338_vm1, %v893_v4  ;;  %v897_v8 = vld [vmem:[%s1072_s5 + $0x18] sm:$0xff]   ;;  %v899_v10 = vld [vmem:[%s1072_s5 + $0x20] sm:$0xff]   ;;  %v901_v12 = vld [vmem:[%s1072_s5 + $0x28] sm:$0xff]  }
  0x1c   : > { %815 = vmatmul.mubr.msk.bf16.vlgmr.msra.gmra.mrb[0].mxu1 %vm338_vm1, %v894_v5  ;;  %802 = vmatprep.mubr.msk.bf16.mxu0 %vm338_vm1, %v895_v6  ;;  %v898_v9 = vld [vmem:[%s1072_s5 + $0x58] sm:$0xff]   ;;  %v900_v11 = vld [vmem:[%s1072_s5 + $0x60] sm:$0xff]   ;;  %v902_v13 = vld [vmem:[%s1072_s5 + $0x68] sm:$0xff]   ;;  %p916_p3 = por %p915_p2, %p914_p1 }
  0x1d   : > { %818 = vmatprep.mubr.msk.bf16.mxu1 %vm338_vm1, %v896_v7  ;;  %v903_v14 = vld [vmem:[%s1072_s5 + $0x30] sm:$0xff]   ;;  %v905_v16 = vld [vmem:[%s1072_s5 + $0x38] sm:$0xff]  }
  0x1e   : > { %v904_v15 = vld [vmem:[%s1072_s5 + $0x70] sm:$0xff]   ;;  %v906_v17 = vld [vmem:[%s1072_s5 + $0x78] sm:$0xff]   ;;  %p917_p5 = pnand %p916_p3, %p910_p0 }
  0x23   : > { %803 = vmatmul.mubr.msk.bf16.gmra.mrb[4].mxu0 %vm338_vm1, %v897_v8 }
  0x24   : > { %819 = vmatmul.mubr.msk.bf16.gmra.mrb[4].mxu1 %vm338_vm1, %v898_v9  ;;  %806 = vmatprep.mubr.msk.bf16.mxu0 %vm338_vm1, %v899_v10 }
  0x25   : > { %822 = vmatprep.mubr.msk.bf16.mxu1 %vm338_vm1, %v900_v11 }
  0x2b   : > { %807 = vmatmul.mubr.msk.bf16.gmra.mrb[8].mxu0 %vm338_vm1, %v901_v12 }
  0x2c   : > { %823 = vmatmul.mubr.msk.bf16.gmra.mrb[8].mxu1 %vm338_vm1, %v902_v13  ;;  %810 = vmatprep.mubr.msk.bf16.mxu0 %vm338_vm1, %v903_v14 }
  0x2d   : > { %826 = vmatprep.mubr.msk.bf16.mxu1 %vm338_vm1, %v904_v15 }
  0x33   : > { %811 = vmatmul.mubr.msk.bf16.gmra.mrb[12].mxu0 %vm338_vm1, %v905_v16 }
  0x34   : > { %827 = vmatmul.mubr.msk.bf16.gmra.mrb[12].mxu1 %vm338_vm1, %v906_v17 }
  0xee   : > { %v800_v19 = vpop.f32.mrb[0].mxu0 }
  0xef   : > { %v434_v20 = vadd.f32 %v800_v19, %v1110_v18  ;;  %v816_v21 = vpop.f32.mrb[0].mxu1  ;;  %v425_v22 = vpop.f32.mrb[1].mxu0 }
  0xf0   : > { %v498_v23 = vadd.f32 %v816_v21, %v1110_v18  ;;  %v426_v24 = vadd.f32 %v1110_v18, %v425_v22  ;;  %v489_v25 = vpop.f32.mrb[1].mxu1  ;;  %v801_v26 = vpop.f32.mrb[2].mxu0 }
  0xf1   : > { %v554_v27 = vmax.f32 %v434_v20, 0.0  ;;  %v490_v28 = vadd.f32 %v1110_v18, %v489_v25  ;;  %v437_v29 = vadd.f32 %v801_v26, %v1110_v18  ;;  %v817_v30 = vpop.f32.mrb[2].mxu1  ;;  %v428_v31 = vpop.f32.mrb[3].mxu0 }
  0xf2   : > { %v570_v32 = vmax.f32 %v498_v23, 0.0  ;;  %v552_v33 = vmax.f32 %v426_v24, 0.0  ;;  %v501_v34 = vadd.f32 %v817_v30, %v1110_v18  ;;  %v429_v35 = vadd.f32 %v1110_v18, %v428_v31  ;;  %v492_v36 = vpop.f32.mrb[3].mxu1 }
  0xf3   : > { %586 = vst [vmem:[%s1121_s10 + $0x10] sm:$0xff] %v554_v27  ;;  %v568_v37 = vmax.f32 %v490_v28, 0.0  ;;  %v555_v38 = vmax.f32 %v437_v29, 0.0  ;;  %v493_v39 = vadd.f32 %v1110_v18, %v492_v36 }
  0xf4   : > { %602 = vst [vmem:[%s1121_s10 + $0x90] sm:$0xff] %v570_v32  ;;  %584 = vst [vmem:[%s1121_s10] sm:$0xff] %v552_v33  ;;  %v571_v40 = vmax.f32 %v501_v34, 0.0  ;;  %v553_v41 = vmax.f32 %v429_v35, 0.0 }
  0xf5   : > { %600 = vst [vmem:[%s1121_s10 + $0x80] sm:$0xff] %v568_v37  ;;  %587 = vst [vmem:[%s1121_s10 + $0x18] sm:$0xff] %v555_v38  ;;  %v569_v42 = vmax.f32 %v493_v39, 0.0 }
  0xf6   : > { %603 = vst [vmem:[%s1121_s10 + $0x98] sm:$0xff] %v571_v40  ;;  %585 = vst [vmem:[%s1121_s10 + $0x8] sm:$0xff] %v553_v41  ;;  %v804_v43 = vpop.f32.mrb[4].mxu0 }
  0xf7   : > { %601 = vst [vmem:[%s1121_s10 + $0x88] sm:$0xff] %v569_v42  ;;  %v450_v44 = vadd.f32 %v804_v43, %v1110_v18  ;;  %v820_v45 = vpop.f32.mrb[4].mxu1  ;;  %v441_v46 = vpop.f32.mrb[5].mxu0 }
  0xf8   : > { %v514_v47 = vadd.f32 %v820_v45, %v1110_v18  ;;  %v442_v48 = vadd.f32 %v1110_v18, %v441_v46  ;;  %v505_v49 = vpop.f32.mrb[5].mxu1  ;;  %v805_v50 = vpop.f32.mrb[6].mxu0 }
  0xf9   : > { %v558_v51 = vmax.f32 %v450_v44, 0.0  ;;  %v506_v52 = vadd.f32 %v1110_v18, %v505_v49  ;;  %v453_v53 = vadd.f32 %v805_v50, %v1110_v18  ;;  %v821_v54 = vpop.f32.mrb[6].mxu1  ;;  %v444_v55 = vpop.f32.mrb[7].mxu0 }
  0xfa   : > { %v574_v56 = vmax.f32 %v514_v47, 0.0  ;;  %v556_v57 = vmax.f32 %v442_v48, 0.0  ;;  %v517_v58 = vadd.f32 %v821_v54, %v1110_v18  ;;  %v445_v59 = vadd.f32 %v1110_v18, %v444_v55  ;;  %v508_v60 = vpop.f32.mrb[7].mxu1 }
  0xfb   : > { %590 = vst [vmem:[%s1121_s10 + $0x30] sm:$0xff] %v558_v51  ;;  %v572_v61 = vmax.f32 %v506_v52, 0.0  ;;  %v559_v62 = vmax.f32 %v453_v53, 0.0  ;;  %v509_v63 = vadd.f32 %v1110_v18, %v508_v60 }
  0xfc   : > { %606 = vst [vmem:[%s1121_s10 + $0xb0] sm:$0xff] %v574_v56  ;;  %588 = vst [vmem:[%s1121_s10 + $0x20] sm:$0xff] %v556_v57  ;;  %v575_v0 = vmax.f32 %v517_v58, 0.0  ;;  %v557_v1 = vmax.f32 %v445_v59, 0.0 }
  0xfd   : > { %604 = vst [vmem:[%s1121_s10 + $0xa0] sm:$0xff] %v572_v61  ;;  %591 = vst [vmem:[%s1121_s10 + $0x38] sm:$0xff] %v559_v62  ;;  %v573_v2 = vmax.f32 %v509_v63, 0.0 }
  0xfe   : > { %607 = vst [vmem:[%s1121_s10 + $0xb8] sm:$0xff] %v575_v0  ;;  %589 = vst [vmem:[%s1121_s10 + $0x28] sm:$0xff] %v557_v1  ;;  %v808_v3 = vpop.f32.mrb[8].mxu0 }
  0xff   : > { %605 = vst [vmem:[%s1121_s10 + $0xa8] sm:$0xff] %v573_v2  ;;  %v466_v4 = vadd.f32 %v808_v3, %v1110_v18  ;;  %v824_v5 = vpop.f32.mrb[8].mxu1  ;;  %v457_v6 = vpop.f32.mrb[9].mxu0 }
 0x100   : > { %v530_v7 = vadd.f32 %v824_v5, %v1110_v18  ;;  %v458_v8 = vadd.f32 %v1110_v18, %v457_v6  ;;  %v521_v9 = vpop.f32.mrb[9].mxu1  ;;  %v809_v10 = vpop.f32.mrb[10].mxu0 }
 0x101   : > { %v562_v11 = vmax.f32 %v466_v4, 0.0  ;;  %v522_v12 = vadd.f32 %v1110_v18, %v521_v9  ;;  %v469_v13 = vadd.f32 %v809_v10, %v1110_v18  ;;  %v825_v14 = vpop.f32.mrb[10].mxu1  ;;  %v460_v15 = vpop.f32.mrb[11].mxu0 }
 0x102   : > { %v578_v16 = vmax.f32 %v530_v7, 0.0  ;;  %v560_v17 = vmax.f32 %v458_v8, 0.0  ;;  %v533_v19 = vadd.f32 %v825_v14, %v1110_v18  ;;  %v461_v20 = vadd.f32 %v1110_v18, %v460_v15  ;;  %v524_v21 = vpop.f32.mrb[11].mxu1 }
 0x103   : > { %594 = vst [vmem:[%s1121_s10 + $0x50] sm:$0xff] %v562_v11  ;;  %v576_v22 = vmax.f32 %v522_v12, 0.0  ;;  %v563_v23 = vmax.f32 %v469_v13, 0.0  ;;  %v525_v24 = vadd.f32 %v1110_v18, %v524_v21 }
 0x104   : > { %610 = vst [vmem:[%s1121_s10 + $0xd0] sm:$0xff] %v578_v16  ;;  %592 = vst [vmem:[%s1121_s10 + $0x40] sm:$0xff] %v560_v17  ;;  %v579_v25 = vmax.f32 %v533_v19, 0.0  ;;  %v561_v26 = vmax.f32 %v461_v20, 0.0 }
 0x105   : > { %608 = vst [vmem:[%s1121_s10 + $0xc0] sm:$0xff] %v576_v22  ;;  %595 = vst [vmem:[%s1121_s10 + $0x58] sm:$0xff] %v563_v23  ;;  %v577_v27 = vmax.f32 %v525_v24, 0.0 }
 0x106   : > { %611 = vst [vmem:[%s1121_s10 + $0xd8] sm:$0xff] %v579_v25  ;;  %593 = vst [vmem:[%s1121_s10 + $0x48] sm:$0xff] %v561_v26  ;;  %v812_v28 = vpop.f32.mrb[12].mxu0 }
 0x107   : > { %609 = vst [vmem:[%s1121_s10 + $0xc8] sm:$0xff] %v577_v27  ;;  %v482_v29 = vadd.f32 %v812_v28, %v1110_v18  ;;  %v828_v30 = vpop.f32.mrb[12].mxu1  ;;  %v473_v31 = vpop.f32.mrb[13].mxu0 }
 0x108   : > { %v546_v32 = vadd.f32 %v828_v30, %v1110_v18  ;;  %v474_v33 = vadd.f32 %v1110_v18, %v473_v31  ;;  %v537_v34 = vpop.f32.mrb[13].mxu1  ;;  %v813_v35 = vpop.f32.mrb[14].mxu0 }
 0x109   : > { %v566_v36 = vmax.f32 %v482_v29, 0.0  ;;  %v538_v37 = vadd.f32 %v1110_v18, %v537_v34  ;;  %v485_v38 = vadd.f32 %v813_v35, %v1110_v18  ;;  %v829_v39 = vpop.f32.mrb[14].mxu1  ;;  %v476_v40 = vpop.f32.mrb[15].mxu0 }
 0x10a   : > { %v582_v41 = vmax.f32 %v546_v32, 0.0  ;;  %v564_v42 = vmax.f32 %v474_v33, 0.0  ;;  %v549_v43 = vadd.f32 %v829_v39, %v1110_v18  ;;  %v477_v44 = vadd.f32 %v1110_v18, %v476_v40  ;;  %v540_v45 = vpop.f32.mrb[15].mxu1 }
 0x10b   : > { %598 = vst [vmem:[%s1121_s10 + $0x70] sm:$0xff] %v566_v36  ;;  %v580_v46 = vmax.f32 %v538_v37, 0.0  ;;  %v567_v47 = vmax.f32 %v485_v38, 0.0  ;;  %v541_v48 = vadd.f32 %v1110_v18, %v540_v45 }
 0x10c   : > { %614 = vst [vmem:[%s1121_s10 + $0xf0] sm:$0xff] %v582_v41  ;;  %596 = vst [vmem:[%s1121_s10 + $0x60] sm:$0xff] %v564_v42  ;;  %v583_v49 = vmax.f32 %v549_v43, 0.0  ;;  %v565_v50 = vmax.f32 %v477_v44, 0.0 }
 0x10d   : > { %612 = vst [vmem:[%s1121_s10 + $0xe0] sm:$0xff] %v580_v46  ;;  %599 = vst [vmem:[%s1121_s10 + $0x78] sm:$0xff] %v567_v47  ;;  %v581_v51 = vmax.f32 %v541_v48, 0.0 }
 0x10e   : > { %615 = vst [vmem:[%s1121_s10 + $0xf8] sm:$0xff] %v583_v49  ;;  %597 = vst [vmem:[%s1121_s10 + $0x68] sm:$0xff] %v565_v50 }
 0x10f   : > { %613 = vst [vmem:[%s1121_s10 + $0xe8] sm:$0xff] %v581_v51 }
 0x110   : > { %920 = shalt.err (!%p917_p5)
}
 0x111   : > { %s921_s30 = scalar_lea.hbm %s1180_s21, 4096  ;;  %s925_s6 = scalar_lea.hbm %s1240_s3, 8192 }
 0x112   : > { %p922_p6 = scmp.ne.s32.totalorder %s1180_s21, %s921_s30  ;;  %p926_p10 = scmp.lt.u32.totalorder %s1180_s21, %s1240_s3 }
 0x113   : > { %p927_p11 = scmp.lt.u32.totalorder %s925_s6, %s921_s30  ;;  %p929_p13 = scmp.lt.u32.totalorder %s921_s30, %s1180_s21 }
 0x114   : > { %p923_p7 = pnand %p922_p6, %p1050_p4 }
 0x115   : > { %p928_p12 = por %p927_p11, %p926_p10 }
 0x116   : > { %p924_p9 = pneg %p923_p7 }
 0x117   : > { %p930_p0 = por %p929_p13, %p928_p12 }
 0x119   : > { %p931_p1 = pnand %p930_p0, %p924_p9 }
 0x11b   : > { %934 = shalt.err (!%p931_p1)
}
 0x11c   : > { %s988_s9 = smov 128   ;;  %s989_s10 = smov 8  }
 0x11d   : > { %834 = dma.vmem_to_hbm [thread:$0]  (%p1050_p4), %s1182_s18, 4096, %s1180_s21, %s1191_s23, %s988_s9, %s988_s9, %s989_s10  }
 0x11e PF: > { %p840_p2 = scmp.ge.s32.totalorder %s985_s17, 2  ;;  %s646_s11 = sand.u32 1, %s965_s12  }
 0x11f   : > { %s647_s15 = scalar_lea.sflag [#allocation3], %s646_s11 }
 0x120   : > { %p837_p3 = pnand %p840_p2, %p1057_p8 }
 0x122   : > { %960 = dma.done.wait (!%p837_p3), %s647_s15, 4096  }
 0x123   : > { %962 = vsyncadd (!%p837_p3), %s647_s15, 4294963200  ;;  %s16_s17 = sadd.s32 1, %s985_s17   ;;  %s1243_s12 = smov %s969_s13 }
 0x124   : > { %p13_p5 = scmp.ge.s32.totalorder %s16_s17, 4   ;;  %s1244_s13 = smov %s973_s14 }
 0x125   : > { %s1245_s14 = smov %s1063_s25  ;;  %s1246_s15 = smov %s981_s16 }
 0x126   : > { %s1247_s16 = smov %s1249_s20  ;;  %15 = sbr.rel (!%p13_p5) target bundleno = 4 (0x4), region = 73 }
 0x12d   :  { %652 = vsyncpa [#allocation3], 1 }
 0x12e   :  { %654 = vsyncpa [#allocation3 + $0x1], 1 }

</bundles_post_ra>
